<compile_context>
chip_gen: v5e
topology: v5e:2x2
jax: 0.10.0
libtpu: 0.0.40
codegen_flags: <defaults>
</compile_context>

<pallas_src>
import functools

import jax
import jax.numpy as jnp
from jax.experimental import pallas as pl
from jax.experimental.pallas import tpu as pltpu


def _round_up(x, m):
    return ((x + m - 1) // m) * m


# --------------------------------------------------------------------------
# Kernel: rows x {comb (2 small matmuls + e add + f32 bias + ReLU),
#                 comb_layer_expand (+ReLU), adapt}.
# --------------------------------------------------------------------------
def _sample_level_kernel(e_ref, c_ref, u_ref, wc_ref, wu_ref, b0_ref,
                         wg_ref, bg_ref, wa_ref, ba_ref, out_ref):
    f32 = jnp.float32
    # comb_layer pre-activation: e is already in comb space (folded LUT);
    # conds / upper contributions are two MXU matmuls; folded bias in f32.
    acc = e_ref[...].astype(f32)
    acc = acc + jnp.dot(c_ref[...], wc_ref[...], preferred_element_type=f32)
    acc = acc + jnp.dot(u_ref[...], wu_ref[...], preferred_element_type=f32)
    comb = jnp.maximum(acc + b0_ref[...], 0.0)
    # comb_layer_expand (1x1 conv) + ReLU.
    g = jnp.maximum(
        jnp.dot(comb.astype(wg_ref.dtype), wg_ref[...],
                preferred_element_type=f32) + bg_ref[...], 0.0)
    # adapt (1x1 conv to q_levels).
    out = jnp.dot(g.astype(wa_ref.dtype), wa_ref[...],
                  preferred_element_type=f32) + ba_ref[...]
    out_ref[...] = out.astype(out_ref.dtype)


# --------------------------------------------------------------------------
# One-time parameter packing (all transposes / algebraic folding hoisted out
# of the forward path).
# --------------------------------------------------------------------------
def pack_params(params):
    f32 = jnp.float32
    bf16 = jnp.bfloat16
    emb_table = params["emb_table"].astype(f32)          # (Qlev, Qlev)
    w_emb_conv = params["w_emb_conv"].astype(f32)        # (H, Qlev, R)
    H, _, _ = w_emb_conv.shape
    w_comb = params["w_comb"].astype(f32)                # (H, 3H)
    w_ce = w_comb[:, :H].T                               # (H, H)  e  -> comb
    w_cc = w_comb[:, H:2 * H].T                          # (H, H)  c  -> comb
    w_cu = w_comb[:, 2 * H:].T                           # (H, H)  up -> comb

    # Embedding + conv(k=R) + e-slice of comb folded into a per-tap LUT:
    #   LUT[r][v, o] = sum_q emb[v, q] * sum_h Wconv[h, q, r] * w_comb[o, h]
    M = jnp.einsum("hqr,ho->rqo", w_emb_conv, w_ce)      # (R, Qlev, H)
    lut = jnp.einsum("vq,rqo->rvo", emb_table, M)        # (R, Qlev, H)

    # conds_expand + c-slice of comb folded into one matrix + one bias.
    w_conds = params["w_conds"].astype(f32)              # (H, C)
    w_c_fold = w_conds.T @ w_cc                          # (C, H)
    b0 = params["b_conds"].astype(f32) @ w_cc + params["b_comb"].astype(f32)

    return {
        "lut": lut,                                           # f32, small
        "w_c": w_c_fold.astype(bf16),                         # (C, H)
        "w_u": w_cu.astype(bf16),                             # (H, H)
        "b0": b0[None, :],                                    # (1, H) f32
        "w_g": params["w_gexp"].astype(f32).T.astype(bf16),   # (H, H)
        "b_g": params["b_gexp"].astype(f32)[None, :],         # (1, H) f32
        "w_a": params["w_adapt"].astype(f32).T.astype(bf16),  # (H, Q)
        "b_a": params["b_adapt"].astype(f32)[None, :],        # (1, Q) f32
    }


# --------------------------------------------------------------------------
# Forward pass.  x:(B, T+R-1) int, conds:(B, Tc, C), upper:(B, T, H).
# Returns (B, T, Qlev) bf16 logits (matches PyTorch .permute(0, 2, 1) layout).
# --------------------------------------------------------------------------
@functools.partial(jax.jit, static_argnames=("tile_rows",))
def sample_level_forward(packed, x, conds, upper, *, tile_rows=4096):
    lut = packed["lut"]                       # (R, Qlev, H)
    w_c, w_u, b0 = packed["w_c"], packed["w_u"], packed["b0"]
    w_g, b_g = packed["w_g"], packed["b_g"]
    w_a, b_a = packed["w_a"], packed["b_a"]

    R, _, H = lut.shape
    C = w_c.shape[0]
    Q = w_a.shape[1]
    B, Tx = x.shape
    T = upper.shape[1]
    Tc = conds.shape[1]
    assert Tx == T + R - 1, "emb conv (VALID, kernel R) must yield T outputs"
    assert T % Tc == 0, "upper length must be an exact multiple of conds frames"
    assert conds.shape[2] == C and upper.shape[2] == H

    # --- XLA-side glue: frame-repeat conds, gather-based folded embedding ---
    upscale = T // Tc
    conds_up = jnp.repeat(conds, upscale, axis=1)             # (B, T, C)
    xi = x.astype(jnp.int32)
    e = lut[0][xi[:, 0:T]]
    for r in range(1, R):
        e = e + lut[r][xi[:, r:r + T]]                        # (B, T, H) f32

    N = B * T
    e = e.astype(jnp.bfloat16).reshape(N, H)                  # bf16 streams
    c = conds_up.astype(jnp.bfloat16).reshape(N, C)
    u = upper.astype(jnp.bfloat16).reshape(N, H)

    # --- row tile selection --------------------------------------------------
    # VMEM footprint uses lane-padded widths (blocks occupy >=128 lanes).
    vmem_row_bytes = (2 * _round_up(H, 128) + _round_up(C, 128)
                      + _round_up(Q, 128)) * 2
    vmem_budget = 24 << 20                                    # double-buffered
    max_tile = max(8, (vmem_budget // (2 * vmem_row_bytes)) // 8 * 8)
    half_n = max(8, _round_up((N + 1) // 2, 8))               # >=2 grid steps
    tile = max(8, min(_round_up(tile_rows, 8), max_tile, half_n))
    N_pad = _round_up(N, tile)
    if N_pad != N:
        pad = ((0, N_pad - N), (0, 0))
        e = jnp.pad(e, pad)
        c = jnp.pad(c, pad)
        u = jnp.pad(u, pad)

    grid = (N_pad // tile,)
    row = lambda i: (i, 0)
    const = lambda i: (0, 0)

    # Cost / VMEM hints (python ints; shapes are static under jit).
    hbm_row_bytes = (2 * H + C + Q) * 2
    weight_bytes = (C * H + 2 * H * H + H * Q) * 2 + (2 * H + Q) * 4
    flops = 2 * N_pad * (C * H + 2 * H * H + H * Q)
    bytes_accessed = N_pad * hbm_row_bytes + weight_bytes
    vmem_limit = int(min(48 << 20,
                         max(16 << 20, 3 * tile * vmem_row_bytes
                             + 4 * weight_bytes)))

    out = pl.pallas_call(
        _sample_level_kernel,
        out_shape=jax.ShapeDtypeStruct((N_pad, Q), jnp.bfloat16),
        grid=grid,
        in_specs=[pl.BlockSpec((tile, H), row),     # e (comb-space)
                  pl.BlockSpec((tile, C), row),     # conds (frame-repeated)
                  pl.BlockSpec((tile, H), row),     # upper conditioning
                  pl.BlockSpec((C, H), const),      # folded conds->comb
                  pl.BlockSpec((H, H), const),      # upper->comb slice
                  pl.BlockSpec((1, H), const),      # folded comb bias (f32)
                  pl.BlockSpec((H, H), const),      # comb_layer_expand W
                  pl.BlockSpec((1, H), const),      # comb_layer_expand b (f32)
                  pl.BlockSpec((H, Q), const),      # adapt W
                  pl.BlockSpec((1, Q), const)],     # adapt b (f32)
        out_specs=pl.BlockSpec((tile, Q), row),
        compiler_params=pltpu.CompilerParams(
            dimension_semantics=("parallel",),
            vmem_limit_bytes=vmem_limit),
        cost_estimate=pl.CostEstimate(flops=flops, transcendentals=0,
                                      bytes_accessed=bytes_accessed),
    )(e, c, u, w_c, w_u, b0, w_g, b_g, w_a, b_a)

    return out[:N].reshape(B, T, Q)


# --------------------------------------------------------------------------
# Pure-JAX f32 reference mirroring the PyTorch forward (NCW convs).
# --------------------------------------------------------------------------
def reference_forward(params, x, conds, upper):
    emb_table = params["emb_table"]
    w_emb_conv = params["w_emb_conv"]
    T = upper.shape[1]
    upscale = T // conds.shape[1]
    conds_up = jnp.repeat(conds, upscale, axis=1)
    emb_out = emb_table[x]                                   # (B, Tx, Q)
    e = jax.lax.conv_general_dilated(
        jnp.transpose(emb_out, (0, 2, 1)), w_emb_conv,
        window_strides=(1,), padding="VALID",
        dimension_numbers=("NCH", "OIH", "NCH"))             # (B, H, T)
    e = jnp.transpose(e, (0, 2, 1))
    c = jnp.einsum("btc,hc->bth", conds_up, params["w_conds"]) + params["b_conds"]
    cat = jnp.concatenate([e, c, upper], axis=-1)
    comb = jax.nn.relu(jnp.einsum("btk,hk->bth", cat, params["w_comb"])
                       + params["b_comb"])
    g = jax.nn.relu(jnp.einsum("bth,oh->bto", comb, params["w_gexp"])
                    + params["b_gexp"])
    return jnp.einsum("bth,qh->btq", g, params["w_adapt"]) + params["b_adapt"]


if __name__ == "__main__":
    # Small synthetic configuration:
    #   q_levels Q=16, rnn_hidden_size[0] H=32, ratios[0] R=4, conds_size C=8
    B, Q, H, R, C = 2, 16, 32, 4, 8
    Tc = 4                 # conds frames
    T = Tc * R             # upper_conditioning (and output) time length = 16
    Tx = T + R - 1         # sample input length so VALID conv gives T outputs

    key = jax.random.PRNGKey(0)
    keys = jax.random.split(key, 13)
    params = {
        "emb_table":  jax.random.normal(keys[0], (Q, Q), jnp.float32) * 0.1,
        "w_emb_conv": jax.random.normal(keys[1], (H, Q, R), jnp.float32) * 0.1,
        "w_conds":    jax.random.normal(keys[2], (H, C), jnp.float32) * 0.1,
        "b_conds":    jax.random.normal(keys[3], (H,), jnp.float32) * 0.1,
        "w_comb":     jax.random.normal(keys[4], (H, 3 * H), jnp.float32) * 0.1,
        "b_comb":     jax.random.normal(keys[5], (H,), jnp.float32) * 0.1,
        "w_gexp":     jax.random.normal(keys[6], (H, H), jnp.float32) * 0.1,
        "b_gexp":     jax.random.normal(keys[7], (H,), jnp.float32) * 0.1,
        "w_adapt":    jax.random.normal(keys[8], (Q, H), jnp.float32) * 0.1,
        "b_adapt":    jax.random.normal(keys[9], (Q,), jnp.float32) * 0.1,
    }

    x = jax.random.randint(keys[10], (B, Tx), 0, Q, jnp.int32)
    conds = jax.random.normal(keys[11], (B, Tc, C), jnp.float32)
    upper = jax.random.normal(keys[12], (B, T, H), jnp.float32)

    packed = pack_params(params)                       # one-time packing
    out = sample_level_forward(packed, x, conds, upper, tile_rows=4096)
    out = jax.block_until_ready(out)

    ref = reference_forward(params, x, conds, upper)
    assert out.shape == (B, T, Q)
    # bf16 activations/weights vs f32 reference -> relaxed tolerance.
    assert jnp.allclose(out.astype(jnp.float32), ref, rtol=5e-2, atol=5e-2), \
        "mismatch vs reference"
    print("KERNEL_OK")
</pallas_src>

<mosaic_0001>
module attributes {stable_mosaic.version = 11 : i64} {
  func.func @_sample_level_kernel(%arg0: i32, %arg1: memref<16x32xbf16, #tpu.memory_space<vmem>>, %arg2: memref<16x8xbf16, #tpu.memory_space<vmem>>, %arg3: memref<16x32xbf16, #tpu.memory_space<vmem>>, %arg4: memref<8x32xbf16, #tpu.memory_space<vmem>>, %arg5: memref<32x32xbf16, #tpu.memory_space<vmem>>, %arg6: memref<1x32xf32, #tpu.memory_space<vmem>>, %arg7: memref<32x32xbf16, #tpu.memory_space<vmem>>, %arg8: memref<1x32xf32, #tpu.memory_space<vmem>>, %arg9: memref<32x16xbf16, #tpu.memory_space<vmem>>, %arg10: memref<1x16xf32, #tpu.memory_space<vmem>>, %arg11: memref<16x16xbf16, #tpu.memory_space<vmem>>) attributes {dimension_semantics = [#tpu.dimension_semantics<parallel>], iteration_bounds = array<i64: 2>, scalar_prefetch = 0 : i64, scratch_operands = 0 : i64, tpu.core_type = #tpu.core_type<tc>, window_params = [{transform_indices = @transform_0, window_bounds = array<i64: 16, 32>}, {transform_indices = @transform_1, window_bounds = array<i64: 16, 8>}, {transform_indices = @transform_2, window_bounds = array<i64: 16, 32>}, {pipeline_mode = #tpu.pipeline_mode<synchronous>, transform_indices = @transform_3, window_bounds = array<i64: 8, 32>}, {pipeline_mode = #tpu.pipeline_mode<synchronous>, transform_indices = @transform_4, window_bounds = array<i64: 32, 32>}, {pipeline_mode = #tpu.pipeline_mode<synchronous>, transform_indices = @transform_5, window_bounds = array<i64: 1, 32>}, {pipeline_mode = #tpu.pipeline_mode<synchronous>, transform_indices = @transform_6, window_bounds = array<i64: 32, 32>}, {pipeline_mode = #tpu.pipeline_mode<synchronous>, transform_indices = @transform_7, window_bounds = array<i64: 1, 32>}, {pipeline_mode = #tpu.pipeline_mode<synchronous>, transform_indices = @transform_8, window_bounds = array<i64: 32, 16>}, {pipeline_mode = #tpu.pipeline_mode<synchronous>, transform_indices = @transform_9, window_bounds = array<i64: 1, 16>}, {transform_indices = @transform_10, window_bounds = array<i64: 16, 16>}]} {
    %c0 = arith.constant 0 : index
    %c0_0 = arith.constant 0 : index
    %0 = vector.load %arg1[%c0, %c0_0] : memref<16x32xbf16, #tpu.memory_space<vmem>>, vector<16x32xbf16>
    %1 = arith.extf %0 : vector<16x32xbf16> to vector<16x32xf32>
    %c0_1 = arith.constant 0 : index
    %c0_2 = arith.constant 0 : index
    %2 = vector.load %arg2[%c0_1, %c0_2] : memref<16x8xbf16, #tpu.memory_space<vmem>>, vector<16x8xbf16>
    %c0_3 = arith.constant 0 : index
    %c0_4 = arith.constant 0 : index
    %3 = vector.load %arg4[%c0_3, %c0_4] : memref<8x32xbf16, #tpu.memory_space<vmem>>, vector<8x32xbf16>
    %cst = arith.constant dense<0.000000e+00> : vector<16x32xf32>
    %4 = tpu.matmul %2, %3, %cst {dimension_numbers = #tpu.dot_dimension_numbers<[1], [0], [0], [1], [0, 0, 1, 1], [], []>} : vector<16x8xbf16>, vector<8x32xbf16>, vector<16x32xf32> -> vector<16x32xf32>
    %5 = arith.addf %1, %4 : vector<16x32xf32>
    %c0_5 = arith.constant 0 : index
    %c0_6 = arith.constant 0 : index
    %6 = vector.load %arg3[%c0_5, %c0_6] : memref<16x32xbf16, #tpu.memory_space<vmem>>, vector<16x32xbf16>
    %c0_7 = arith.constant 0 : index
    %c0_8 = arith.constant 0 : index
    %7 = vector.load %arg5[%c0_7, %c0_8] : memref<32x32xbf16, #tpu.memory_space<vmem>>, vector<32x32xbf16>
    %cst_9 = arith.constant dense<0.000000e+00> : vector<16x32xf32>
    %8 = tpu.matmul %6, %7, %cst_9 {dimension_numbers = #tpu.dot_dimension_numbers<[1], [0], [0], [1], [0, 0, 1, 1], [], []>} : vector<16x32xbf16>, vector<32x32xbf16>, vector<16x32xf32> -> vector<16x32xf32>
    %9 = arith.addf %5, %8 : vector<16x32xf32>
    %c0_10 = arith.constant 0 : index
    %c0_11 = arith.constant 0 : index
    %10 = vector.load %arg6[%c0_10, %c0_11] : memref<1x32xf32, #tpu.memory_space<vmem>>, vector<1x32xf32>
    %11 = vector.broadcast %10 : vector<1x32xf32> to vector<16x32xf32>
    %12 = arith.addf %9, %11 : vector<16x32xf32>
    %cst_12 = arith.constant 0.000000e+00 : f32
    %13 = vector.broadcast %cst_12 : f32 to vector<16x32xf32>
    %14 = arith.maximumf %12, %13 : vector<16x32xf32>
    %15 = arith.truncf %14 : vector<16x32xf32> to vector<16x32xbf16>
    %c0_13 = arith.constant 0 : index
    %c0_14 = arith.constant 0 : index
    %16 = vector.load %arg7[%c0_13, %c0_14] : memref<32x32xbf16, #tpu.memory_space<vmem>>, vector<32x32xbf16>
    %cst_15 = arith.constant dense<0.000000e+00> : vector<16x32xf32>
    %17 = tpu.matmul %15, %16, %cst_15 {dimension_numbers = #tpu.dot_dimension_numbers<[1], [0], [0], [1], [0, 0, 1, 1], [], []>} : vector<16x32xbf16>, vector<32x32xbf16>, vector<16x32xf32> -> vector<16x32xf32>
    %c0_16 = arith.constant 0 : index
    %c0_17 = arith.constant 0 : index
    %18 = vector.load %arg8[%c0_16, %c0_17] : memref<1x32xf32, #tpu.memory_space<vmem>>, vector<1x32xf32>
    %19 = vector.broadcast %18 : vector<1x32xf32> to vector<16x32xf32>
    %20 = arith.addf %17, %19 : vector<16x32xf32>
    %cst_18 = arith.constant 0.000000e+00 : f32
    %21 = vector.broadcast %cst_18 : f32 to vector<16x32xf32>
    %22 = arith.maximumf %20, %21 : vector<16x32xf32>
    %23 = arith.truncf %22 : vector<16x32xf32> to vector<16x32xbf16>
    %c0_19 = arith.constant 0 : index
    %c0_20 = arith.constant 0 : index
    %24 = vector.load %arg9[%c0_19, %c0_20] : memref<32x16xbf16, #tpu.memory_space<vmem>>, vector<32x16xbf16>
    %cst_21 = arith.constant dense<0.000000e+00> : vector<16x16xf32>
    %25 = tpu.matmul %23, %24, %cst_21 {dimension_numbers = #tpu.dot_dimension_numbers<[1], [0], [0], [1], [0, 0, 1, 1], [], []>} : vector<16x32xbf16>, vector<32x16xbf16>, vector<16x16xf32> -> vector<16x16xf32>
    %c0_22 = arith.constant 0 : index
    %c0_23 = arith.constant 0 : index
    %26 = vector.load %arg10[%c0_22, %c0_23] : memref<1x16xf32, #tpu.memory_space<vmem>>, vector<1x16xf32>
    %27 = vector.broadcast %26 : vector<1x16xf32> to vector<16x16xf32>
    %28 = arith.addf %25, %27 : vector<16x16xf32>
    %29 = arith.truncf %28 : vector<16x16xf32> to vector<16x16xbf16>
    %c0_24 = arith.constant 0 : index
    %c0_25 = arith.constant 0 : index
    %30 = vector.load %arg11[%c0_24, %c0_25] : memref<16x16xbf16, #tpu.memory_space<vmem>>, vector<16x16xbf16>
    tpu.vector_store %arg11[%c0_24, %c0_25], %29 {strides = array<i32>} : memref<16x16xbf16, #tpu.memory_space<vmem>>, vector<16x16xbf16>,
    return
  }
  func.func @transform_0(%arg0: i32) -> (i32, i32) {
    %c0_i32 = arith.constant 0 : i32
    %c0_i32_0 = arith.constant 0 : i32
    return %arg0, %c0_i32 : i32, i32
  }
  func.func @transform_1(%arg0: i32) -> (i32, i32) {
    %c0_i32 = arith.constant 0 : i32
    %c0_i32_0 = arith.constant 0 : i32
    return %arg0, %c0_i32 : i32, i32
  }
  func.func @transform_2(%arg0: i32) -> (i32, i32) {
    %c0_i32 = arith.constant 0 : i32
    %c0_i32_0 = arith.constant 0 : i32
    return %arg0, %c0_i32 : i32, i32
  }
  func.func @transform_3(%arg0: i32) -> (i32, i32) {
    %c0_i32 = arith.constant 0 : i32
    %c0_i32_0 = arith.constant 0 : i32
    %c0_i32_1 = arith.constant 0 : i32
    return %c0_i32, %c0_i32_0 : i32, i32
  }
  func.func @transform_4(%arg0: i32) -> (i32, i32) {
    %c0_i32 = arith.constant 0 : i32
    %c0_i32_0 = arith.constant 0 : i32
    %c0_i32_1 = arith.constant 0 : i32
    return %c0_i32, %c0_i32_0 : i32, i32
  }
  func.func @transform_5(%arg0: i32) -> (i32, i32) {
    %c0_i32 = arith.constant 0 : i32
    %c0_i32_0 = arith.constant 0 : i32
    %c0_i32_1 = arith.constant 0 : i32
    return %c0_i32, %c0_i32_0 : i32, i32
  }
  func.func @transform_6(%arg0: i32) -> (i32, i32) {
    %c0_i32 = arith.constant 0 : i32
    %c0_i32_0 = arith.constant 0 : i32
    %c0_i32_1 = arith.constant 0 : i32
    return %c0_i32, %c0_i32_0 : i32, i32
  }
  func.func @transform_7(%arg0: i32) -> (i32, i32) {
    %c0_i32 = arith.constant 0 : i32
    %c0_i32_0 = arith.constant 0 : i32
    %c0_i32_1 = arith.constant 0 : i32
    return %c0_i32, %c0_i32_0 : i32, i32
  }
  func.func @transform_8(%arg0: i32) -> (i32, i32) {
    %c0_i32 = arith.constant 0 : i32
    %c0_i32_0 = arith.constant 0 : i32
    %c0_i32_1 = arith.constant 0 : i32
    return %c0_i32, %c0_i32_0 : i32, i32
  }
  func.func @transform_9(%arg0: i32) -> (i32, i32) {
    %c0_i32 = arith.constant 0 : i32
    %c0_i32_0 = arith.constant 0 : i32
    %c0_i32_1 = arith.constant 0 : i32
    return %c0_i32, %c0_i32_0 : i32, i32
  }
  func.func @transform_10(%arg0: i32) -> (i32, i32) {
    %c0_i32 = arith.constant 0 : i32
    %c0_i32_0 = arith.constant 0 : i32
    return %arg0, %c0_i32 : i32, i32
  }
}

</mosaic_0001>

<bundles_post_ra>
// kernel: sample_level_forward.1
= control target key start
LH: loop header
LB: loop body
LE: loop exit
PB: predicated region body
PF: predicated region fallthrough
CT: control target
= control target key end

     0   :  { %15 = vsyncpa [#allocation3], 0  ;;  %s1031_s0 = inlined_call_operand.vmem [shape: bf16[32,32], index: 0, kind: input, shape index: {}]   ;;  %s1032_s1 = inlined_call_operand.vmem [shape: bf16[32,8], index: 1, kind: input, shape index: {}]   ;;  %s1033_s2 = inlined_call_operand.vmem [shape: bf16[32,32], index: 2, kind: input, shape index: {}]   ;;  %s1034_s3 = inlined_call_operand.vmem [shape: bf16[8,32], index: 3, kind: input, shape index: {}]   ;;  %s1035_s4 = inlined_call_operand.vmem [shape: bf16[32,32], index: 4, kind: input, shape index: {}]   ;;  %s1036_s5 = inlined_call_operand.vmem [shape: f32[1,32], index: 5, kind: input, shape index: {}]   ;;  %s1037_s6 = inlined_call_operand.vmem [shape: bf16[32,32], index: 6, kind: input, shape index: {}]   ;;  %s1038_s7 = inlined_call_operand.vmem [shape: f32[1,32], index: 7, kind: input, shape index: {}]   ;;  %s1039_s8 = inlined_call_operand.vmem [shape: bf16[32,16], index: 8, kind: input, shape index: {}]   ;;  %s1040_s9 = inlined_call_operand.vmem [shape: f32[1,16], index: 9, kind: input, shape index: {}]   ;;  %s1041_s10 = inlined_call_operand.hbm [shape: bf16[32,16], index: 10, kind: output, shape index: {}]  }
   0x1   :  { %17 = vsyncpa [#allocation3 + $0x1], 0  ;;  %s908_s13 = smov 0   ;;  %s910_s14 = smov 0  }
   0x2   :  { %s912_s15 = smov 0   ;;  %s914_s16 = smov 0  }
   0x3 LB: > { %s929_s17 = sadd.s32 4294967295, %s849_s16   ;;  %s678_s18 = sadd.s32 4294967294, %s849_s16   ;;  %s849_s16 = sphi %s914_s16, %s1047_s16   ;;  %s845_s15 = sphi %s912_s15, %s1046_s15   ;;  %s841_s14 = sphi %s910_s14, %s1045_s14   ;;  %s837_s13 = sphi %s908_s13, %s1044_s13  }
   0x4   : > { %s933_s19 = sadd.s32 1, %s849_s16   ;;  %s255_s20 = sadd.s32 1, %s845_s15 }
   0x5   : > { %s252_s21 = ssub.s32 %s849_s16, %s933_s19  ;;  %p265_p0 = scmp.ne.s32.totalorder %s845_s15, %s841_s14 }
   0x6   : > { %p253_p1 = scmp.eq.s32.totalorder %s252_s21, 0  ;;  %p266_p2 = scmp.eq.s32.totalorder %s929_s17, 1 }
   0x7   : > { %p271_p3 = scmp.ne.s32.totalorder %s841_s14, %s837_s13  ;;  %p272_p4 = scmp.eq.s32.totalorder %s678_s18, 1 }
   0x8   : > { %s944_s22 = scalar_select %p253_p1, %s845_s15, %s255_s20  }
   0x9   : > { %p946_p5 = por %p266_p2, %p265_p0  ;;  %p950_p6 = por %p272_p4, %p271_p3 }
   0xa   : > { %p681_p7 = scmp.ge.s32.totalorder %s849_s16, 1  ;;  %p338_p8 = scmp.lt.s32.totalorder %s849_s16, 3 }
   0xc   : > { %p339_p9 = pnand %p681_p7, %p338_p8 }
   0xd   : > { %s683_s29 = sshll.u32 (!%p339_p9), %s929_s17, 1  ;;  %s383_s18 = sand.u32 (!%p339_p9), 1, %s841_s14  }
   0xe   : > { %342 = sbr.rel (%p339_p9) target bundleno = 463 (0x1cf), region = 60  ;;  %p387_p10 = scmp.lt.s32.totalorder (!%p339_p9), %s683_s29, 3 }
   0xf   : > { %s738_s26 = sshll.u32 (!%p339_p9), %s929_s17, 3  ;;  %s577_s20 = scalar_lea.sflag (!%p339_p9), [#allocation3], %s383_s18 }
  0x10   : > { %s588_s28 = scalar_lea.hbm (!%p339_p9), %s1041_s10, %s738_s26 }
  0x11   : > { %s591_s11 = sshll.u32 (!%p339_p9), %s588_s28, 4  ;;  %s592_s11 = int_to_ptr.hbm [resolvable:$true] %s591_s11 }
  0x13   : > { %v733_v0 = vld [vmem:[%s1035_s4 + $0x8] sm:$0xff]  ;;  %v412_v1 = vld [vmem:[%s1034_s3] sm:$0xf]  ;;  %vm422_vm0 = vcmask 1043456   ;;  %s1049_s29 = smov (!%p387_p10, %s683_s29), 3  ;;  %vm418_vm1 = vcmask 64512  }
  0x14   : > { %v424_v2 = vsel %vm422_vm0, %v412_v1, 0  ;;  %475 = vmatpush.bf16.msra.mxu1 %v733_v0  ;;  %v732_v3 = vld [vmem:[%s1035_s4] sm:$0xff]  ;;  %s684_s12 = sshll.u32 %s1049_s29, 2  ;;  %vm465_vm2 = vcmask 261120   ;;  %v735_v6 = vld [vmem:[%s1037_s6 + $0x8] sm:$0xff]  ;;  %vm573_vm3 = vcmask 125952  }
  0x15   : > { %433 = vmatpush.bf16.msra.mxu0 %v424_v2  ;;  %s396_s21 = scalar_lea.vmem %s1032_s1, %s684_s12  ;;  %s402_s27 = scalar_lea.vmem %s1033_s2, %s684_s12  ;;  %523 = vmatpush.bf16.msra.mxu2 %v735_v6  ;;  %v734_v7 = vld [vmem:[%s1037_s6] sm:$0xff]  ;;  %v737_v25 = vld [vmem:[%s1039_s8 + $0x8] sm:$0xff] }
  0x16   : > { %v730_v4 = vld [vmem:[%s396_s21] sm:$0xff]  ;;  %s390_s25 = scalar_lea.vmem %s1031_s0, %s684_s12  ;;  %563 = vmatpush.bf16.msra.mxu3 %v737_v25  ;;  %s682_s21 = sshll.u32 %s383_s18, 3 }
  0x17   : > { %v731_v5 = vld [vmem:[%s402_s27] sm:$0xff]  ;;  %s385_s30 = scalar_lea.vmem [#allocation2], %s682_s21  ;;  %s807_s21 = scalar_lea.hbm %s1041_s10, 16 }
  0x18   : > { %476 = vmatpush.bf16.msra.mxu1 %v732_v3  ;;  %693 = vmatmul.msk.bf16.vlgmr.msra.gmra.mxu0 %vm418_vm1, %v730_v4  ;;  %v740_v8 = vld [vmem:[%s390_s25] sm:$0xff]   ;;  %s589_s29 = sshll.u32 %s385_s30, 4  ;;  %s801_s25 = sshra.s32 %s592_s11, 4  ;;  %s590_s29 = int_to_ptr.vmem [resolvable:$true] %s589_s29  ;;  %s802_s25 = int_to_ptr.hbm [resolvable:$true] %s801_s25 }
  0x19   : > { %524 = vmatpush.bf16.msra.mxu2 %v734_v7  ;;  %v741_v9 = vunpack.c.l.bf16 %v740_v8  ;;  %v742_v13 = vunpack.c.h.bf16 %v740_v8  ;;  %v784_v15 = vld [vmem:[%s1036_s5] ss:$0 sm:$0xff]  ;;  %s803_s17 = scalar_lea.hbm %s802_s25, 8  ;;  %p808_p0 = scmp.lt.s32.totalorder %s802_s25, %s1041_s10 }
  0x1a   : > { %v736_v26 = vld [vmem:[%s1039_s8] sm:$0xff]  ;;  %p804_p11 = scmp.ne.s32.totalorder %s802_s25, %s803_s17  ;;  %p809_p1 = scmp.lt.s32.totalorder %s807_s21, %s803_s17 }
  0x1b   : > { %706 = vmatmul.msk.bf16.vlgmr.msra.gmra.mxu1 %vm465_vm2, %v731_v5  ;;  %564 = vmatpush.bf16.msra.mxu3 %v736_v26  ;;  %v785_v28 = vld [vmem:[%s1038_s7] ss:$0 sm:$0xff] }
  0x1c   : > { %v786_v35 = vld [vmem:[%s1040_s9] ss:$0 sm:$0xff]  ;;  %p805_p12 = pnand %p804_p11, %p946_p5  ;;  %p810_p2 = por %p809_p1, %p808_p0 }
  0x1e   : > { %p806_p13 = pneg %p805_p12 }
  0x20   : > { %p811_p3 = pnand %p810_p2, %p806_p13 }
  0x95   : > { %v435_v10 = vpop.f32.mrf.mxu0 }
  0x96   : > { %v440_v12 = vadd.f32 %v741_v9, %v435_v10 }
  0x98   : > { %v478_v11 = vpop.f32.mrf.mxu1 }
  0x99   : > { %v483_v14 = vadd.f32 %v478_v11, %v440_v12 }
  0x9b   : > { %v489_v19 = vadd.f32 %v784_v15, %v483_v14 }
  0x9d   : > { %v437_v16 = vpop.f32.mrf.mxu0  ;;  %v491_v22 = vmax.f32 %v489_v19, 0.0 }
  0x9e   : > { %v441_v17 = vadd.f32 %v742_v13, %v437_v16 }
  0xa0   : > { %v480_v18 = vpop.f32.mrf.mxu1 }
  0xa1   : > { %v484_v20 = vadd.f32 %v480_v18, %v441_v17 }
  0xa3   : > { %v490_v21 = vadd.f32 %v784_v15, %v484_v20 }
  0xa5   : > { %v492_v23 = vmax.f32 %v490_v21, 0.0 }
  0xa7   : > { %v493_v24 = vpack.c.bf16 %v492_v23, %v491_v22 }
  0xa9   : > { %715 = vmatmul.msk.bf16.vlgmr.msra.gmra.mxu2 %vm465_vm2, %v493_v24 }
 0x12c   : > { %v526_v27 = vpop.f32.mrf.mxu2 }
 0x12d   : > { %v527_v29 = vadd.f32 %v785_v28, %v526_v27 }
 0x12f   : > { %v531_v32 = vmax.f32 %v527_v29, 0.0 }
 0x134   : > { %v528_v30 = vpop.f32.mrf.mxu2 }
 0x135   : > { %v529_v31 = vadd.f32 %v785_v28, %v528_v30 }
 0x137   : > { %v532_v33 = vmax.f32 %v529_v31, 0.0 }
 0x139   : > { %v533_v34 = vpack.c.bf16 %v532_v33, %v531_v32 }
 0x13b   : > { %724 = vmatmul.msk.bf16.vlgmr.msra.gmra.mxu3 %vm465_vm2, %v533_v34 }
 0x1be   : > { %v566_v36 = vpop.f32.mrf.mxu3 }
 0x1bf   : > { %v567_v37 = vadd.f32 %v786_v35, %v566_v36 }
 0x1c1   : > { %v571_v38 = vpack.c.bf16 %v567_v37, %v567_v37 }
 0x1c3   : > { %574 = vst.msk [vmem:[%s385_s30] sm:$0xf] %vm573_vm3, %v571_v38 }
 0x1c6   : > { %v568_v39 = vpop.f32.mrf.mxu3 }
 0x1c7   : > { %v569_v40 = vadd.f32 %v786_v35, %v568_v39 }
 0x1c9   : > { %v572_v41 = vpack.c.bf16 %v569_v40, %v569_v40 }
 0x1cb   : > { %575 = vst.msk [vmem:[%s385_s30 + $0x4] sm:$0xf] %vm573_vm3, %v572_v41 }
 0x1cc   : > { %814 = shalt.err (!%p811_p3)
}
 0x1cd   : > { %s851_s18 = smov 64   ;;  %s852_s30 = smov 4  }
 0x1ce   : > { %743 = dma.vmem_to_hbm [thread:$0]  (%p946_p5), %s590_s29, 128, %s592_s11, %s577_s20, %s851_s18, %s851_s18, %s852_s30  }
 0x1cf PF: > { %p749_p4 = scmp.ge.s32.totalorder %s849_s16, 2  ;;  %s606_s26 = sand.u32 1, %s837_s13  }
 0x1d0   : > { %s607_s12 = scalar_lea.sflag [#allocation3], %s606_s26 }
 0x1d1   : > { %p746_p7 = pnand %p749_p4, %p950_p6 }
 0x1d3   : > { %p747_p8 = pneg %p746_p7 }
 0x1d5   : > { %832 = dma.done.wait (%p747_p8), %s607_s12, 128  }
 0x1d6   : > { %834 = vsyncadd (%p747_p8), %s607_s12, 4294967168  ;;  %p20_p9 = scmp.ge.s32.totalorder %s933_s19, 4   ;;  %s1044_s13 = smov %s841_s14 }
 0x1d7   : > { %s1045_s14 = smov %s845_s15  ;;  %s1046_s15 = smov %s944_s22 }
 0x1d8   : > { %s1047_s16 = smov %s933_s19  ;;  %22 = sbr.rel (!%p20_p9) target bundleno = 3 (0x3), region = 101 }
 0x1dd   :  { %613 = vsyncpa [#allocation3], 1 }
 0x1de   :  { %615 = vsyncpa [#allocation3 + $0x1], 1 }

</bundles_post_ra>
